<compile_context>
chip_gen: v6e
topology: v6e:2x2x1
jax: 0.10.0
libtpu: 0.0.40
codegen_flags: <defaults>
</compile_context>

<pallas_src>
import math

import jax
import jax.numpy as jnp
from jax.experimental import pallas as pl
from jax.experimental.pallas import tpu as pltpu

OUT_FEATURES = 14

_LANE = 128
_SUBLANE = 8
_MAX_TILE_ROWS = 2048       # pipelining sweet spot per measured roofline data
_MIN_GOOD_TILE_ROWS = 512   # below this, per-step overhead starts to show
_SCRATCH_MARGIN = 2 * 1024 * 1024  # compiler-internal scratch headroom


def _round_up(n, m):
    return (n + m - 1) // m * m


def _vmem_limit_bytes():
    """Per-generation scoped-VMEM request (v5e/v6e: 128 MiB, v7x: 64 MiB/TC)."""
    try:
        phys = int(pltpu.get_tpu_info().vmem_capacity_bytes)
    except Exception:
        phys = 64 * 1024 * 1024  # conservative fallback: v7x per-TC VMEM
    return (phys * 3) // 4       # leave headroom over the physical capacity


def _largest_tk_divisor(d, cap):
    """Largest multiple of 128 that divides d and is <= cap (None if none)."""
    t = (min(d, max(cap, _LANE)) // _LANE) * _LANE
    while t >= _LANE:
        if d % t == 0:
            return t
        t -= _LANE
    return None


def _plan_tiles(batch, d, x_itemsize, vmem_limit):
    """Pick (tile_rows, tile_k) from honest lane-padded VMEM accounting."""
    bp8 = _round_up(batch, _SUBLANE)
    # Keep >= 4 grid steps along the batch axis when the batch allows it so the
    # "parallel" axis shards across both v7x TensorCores (and evenly so).
    cap_cores = max(_SUBLANE, _round_up(pl.cdiv(bp8, 4), _SUBLANE))
    tb_target = min(bp8, cap_cores, _MAX_TILE_ROWS)

    # Fixed lane-padded VMEM residents (conservative caps, independent of TB):
    out_fp = 2 * _MAX_TILE_ROWS * _LANE * 4   # double-buffered output tile
    acc_fp = _MAX_TILE_ROWS * _LANE * 4       # f32 accumulator scratch
    bias_fp = _SUBLANE * _LANE * 4
    avail = vmem_limit - _SCRATCH_MARGIN - out_fp - acc_fp - bias_fp

    def tb_for(tk):
        wt_fp = 2 * _round_up(tk, _SUBLANE) * _LANE * 4  # weight, lane-padded
        x_budget = avail - wt_fp
        tb = (x_budget // (2 * tk * x_itemsize)) // _SUBLANE * _SUBLANE
        return max(_SUBLANE, min(tb, tb_target))

    # First try: full contraction resident (no K tiling).
    tk = d
    tb = tb_for(tk)

    # If VMEM forces the row tile below the sweet spot and the contraction can
    # be split exactly on 128-lane boundaries, tile K instead of shrinking TB.
    if tb < min(_MIN_GOOD_TILE_ROWS, tb_target) and d % _LANE == 0:
        wt_row_bytes = 2 * _LANE * 4
        tk_cap = max(_LANE, avail // (2 * tb_target * x_itemsize + wt_row_bytes))
        tk_new = _largest_tk_divisor(d, tk_cap)
        if tk_new is not None and tk_new < d:
            tk = tk_new
            tb = tb_for(tk)
    # Note: if D is huge and NOT a multiple of 128 we keep TK=D and the smallest
    # row tile; the compiler may re-limit buffers in that (rare) configuration.

    if tb >= batch:
        tb = batch  # single full-extent row block is always layout-legal
    if tk >= d:
        tk = d
    return tb, tk


def fc_kernel(x_ref, wt_ref, b_ref, o_ref, acc_ref):
    # x_ref: (TB, TK)  wt_ref: (TK, 14)  b_ref: (1, 14)
    # o_ref: (TB, 14)  acc_ref: (TB, 14) f32 scratch
    k = pl.program_id(1)

    @pl.when(k == 0)
    def _init():
        acc_ref[...] = jnp.zeros_like(acc_ref)

    acc_ref[...] += jnp.dot(x_ref[...], wt_ref[...],
                            preferred_element_type=jnp.float32)

    @pl.when(k == pl.num_programs(1) - 1)
    def _store():
        o_ref[...] = (acc_ref[...] + b_ref[...]).astype(o_ref.dtype)


def fc_layer_14(x, wt, b2, *, tile_rows=None, tile_k=None):
    """x: (B, D), wt: (D, 14) pre-transposed weight, b2: (1, 14) bias.

    Returns (B, 14).  Equivalent to nn.Linear(D, 14): x @ W^T + b.
    """
    B, D = x.shape
    assert wt.shape == (D, OUT_FEATURES)
    assert b2.shape == (1, OUT_FEATURES)

    vmem_limit = _vmem_limit_bytes()
    tb_auto, tk_auto = _plan_tiles(B, D, int(jnp.dtype(x.dtype).itemsize),
                                   vmem_limit)
    tb = tile_rows if tile_rows is not None else tb_auto
    tk = tile_k if tile_k is not None else tk_auto
    assert D % tk == 0, "contraction tile must divide D exactly"

    grid = (pl.cdiv(B, tb), D // tk)  # ragged last row tile -> masked stores

    out = pl.pallas_call(
        fc_kernel,
        out_shape=jax.ShapeDtypeStruct((B, OUT_FEATURES), x.dtype),
        grid=grid,
        in_specs=[
            # x streams through VMEM, double-buffered by the Pallas pipeline.
            pl.BlockSpec((tb, tk), lambda i, k: (i, k)),
            # weight tile changes only with k; bias is fully resident.
            pl.BlockSpec((tk, OUT_FEATURES), lambda i, k: (k, 0)),
            pl.BlockSpec((1, OUT_FEATURES), lambda i, k: (0, 0)),
        ],
        out_specs=pl.BlockSpec((tb, OUT_FEATURES), lambda i, k: (i, 0)),
        scratch_shapes=[pltpu.VMEM((tb, OUT_FEATURES), jnp.float32)],
        compiler_params=pltpu.CompilerParams(
            dimension_semantics=("parallel", "arbitrary"),
            vmem_limit_bytes=int(vmem_limit),
        ),
        cost_estimate=pl.CostEstimate(
            flops=2 * B * D * OUT_FEATURES,
            bytes_accessed=int(B * D * jnp.dtype(x.dtype).itemsize
                               + D * OUT_FEATURES * 4
                               + B * OUT_FEATURES * 4),
            transcendentals=0,
        ),
    )(x, wt, b2)
    return out


def prepare_params(weight, bias):
    """Hoisted out of the hot path: pre-transpose W and reshape b once."""
    wt = jnp.asarray(weight).T            # (D, 14)
    b2 = jnp.asarray(bias).reshape(1, OUT_FEATURES)
    return wt, b2


def init_params(key, input_size):
    # Deterministic init mimicking nn.Linear: U(-1/sqrt(in), 1/sqrt(in)).
    kw, kb = jax.random.split(key)
    bound = 1.0 / math.sqrt(input_size)
    weight = jax.random.uniform(
        kw, (OUT_FEATURES, input_size), jnp.float32, -bound, bound)
    bias = jax.random.uniform(
        kb, (OUT_FEATURES,), jnp.float32, -bound, bound)
    return weight, bias


if __name__ == "__main__":
    key = jax.random.PRNGKey(0)
    k_x, k_p, k_x2, k_p2 = jax.random.split(key, 4)

    # Case 1: small, evenly tiled batch (single grid step).
    batch, input_size = 8, 32
    x = jax.random.normal(k_x, (batch, input_size), jnp.float32)
    weight, bias = init_params(k_p, input_size)
    wt, b2 = prepare_params(weight, bias)
    out = jax.block_until_ready(fc_layer_14(x, wt, b2))
    ref = x @ weight.T + bias
    assert out.shape == (batch, OUT_FEATURES)
    assert jnp.allclose(out, ref, atol=1e-5, rtol=1e-5)

    # Case 2: ragged batch (exercises masked last row tile, no pad copy) and a
    # forced K-tiled contraction (exercises the accumulator / pl.when path).
    batch2, input_size2 = 37, 256
    x2 = jax.random.normal(k_x2, (batch2, input_size2), jnp.float32)
    weight2, bias2 = init_params(k_p2, input_size2)
    wt2, b22 = prepare_params(weight2, bias2)
    out2 = jax.block_until_ready(fc_layer_14(x2, wt2, b22, tile_k=128))
    ref2 = x2 @ weight2.T + bias2
    assert out2.shape == (batch2, OUT_FEATURES)
    assert jnp.allclose(out2, ref2, atol=1e-4, rtol=1e-4)

    print("KERNEL_OK")
</pallas_src>

<mosaic_0001>
module attributes {stable_mosaic.version = 11 : i64} {
  func.func @fc_kernel(%arg0: i32, %arg1: i32, %arg2: memref<8x32xf32, #tpu.memory_space<vmem>>, %arg3: memref<32x14xf32, #tpu.memory_space<vmem>>, %arg4: memref<1x14xf32, #tpu.memory_space<vmem>>, %arg5: memref<8x14xf32, #tpu.memory_space<vmem>>, %arg6: memref<8x14xf32, #tpu.memory_space<vmem>>) attributes {dimension_semantics = [#tpu.dimension_semantics<parallel>, #tpu.dimension_semantics<arbitrary>], iteration_bounds = array<i64: 1, 1>, scalar_prefetch = 0 : i64, scratch_operands = 1 : i64, tpu.core_type = #tpu.core_type<tc>, window_params = [{transform_indices = @transform_0, window_bounds = array<i64: 8, 32>}, {transform_indices = @transform_1, window_bounds = array<i64: 32, 14>}, {pipeline_mode = #tpu.pipeline_mode<synchronous>, transform_indices = @transform_2, window_bounds = array<i64: 1, 14>}, {transform_indices = @transform_3, window_bounds = array<i64: 8, 14>}]} {
    %c0_i32 = arith.constant 0 : i32
    %0 = arith.cmpi eq, %arg1, %c0_i32 : i32
    %1 = arith.extui %0 : i1 to i32
    %c0_i32_0 = arith.constant 0 : i32
    %2 = arith.cmpi ne, %1, %c0_i32_0 : i32
    scf.if %2 {
      %cst_10 = arith.constant 0.000000e+00 : f32
      %12 = vector.broadcast %cst_10 : f32 to vector<8x14xf32>
      %c0_11 = arith.constant 0 : index
      %c0_12 = arith.constant 0 : index
      %13 = vector.load %arg6[%c0_11, %c0_12] : memref<8x14xf32, #tpu.memory_space<vmem>>, vector<8x14xf32>
      tpu.vector_store %arg6[%c0_11, %c0_12], %12 {strides = array<i32>} : memref<8x14xf32, #tpu.memory_space<vmem>>, vector<8x14xf32>,
    } else {
    }
    %c0 = arith.constant 0 : index
    %c0_1 = arith.constant 0 : index
    %3 = vector.load %arg6[%c0, %c0_1] : memref<8x14xf32, #tpu.memory_space<vmem>>, vector<8x14xf32>
    %c0_2 = arith.constant 0 : index
    %c0_3 = arith.constant 0 : index
    %4 = vector.load %arg2[%c0_2, %c0_3] : memref<8x32xf32, #tpu.memory_space<vmem>>, vector<8x32xf32>
    %c0_4 = arith.constant 0 : index
    %c0_5 = arith.constant 0 : index
    %5 = vector.load %arg3[%c0_4, %c0_5] : memref<32x14xf32, #tpu.memory_space<vmem>>, vector<32x14xf32>
    %cst = arith.constant dense<0.000000e+00> : vector<8x14xf32>
    %6 = tpu.matmul %4, %5, %cst {dimension_numbers = #tpu.dot_dimension_numbers<[1], [0], [0], [1], [0, 0, 1, 1], [], []>} : vector<8x32xf32>, vector<32x14xf32>, vector<8x14xf32> -> vector<8x14xf32>
    %7 = arith.addf %3, %6 : vector<8x14xf32>
    %c0_6 = arith.constant 0 : index
    %c0_7 = arith.constant 0 : index
    %8 = vector.load %arg6[%c0_6, %c0_7] : memref<8x14xf32, #tpu.memory_space<vmem>>, vector<8x14xf32>
    tpu.vector_store %arg6[%c0_6, %c0_7], %7 {strides = array<i32>} : memref<8x14xf32, #tpu.memory_space<vmem>>, vector<8x14xf32>,
    %c0_i32_8 = arith.constant 0 : i32
    %9 = arith.cmpi eq, %arg1, %c0_i32_8 : i32
    %10 = arith.extui %9 : i1 to i32
    %c0_i32_9 = arith.constant 0 : i32
    %11 = arith.cmpi ne, %10, %c0_i32_9 : i32
    scf.if %11 {
      %c0_10 = arith.constant 0 : index
      %c0_11 = arith.constant 0 : index
      %12 = vector.load %arg6[%c0_10, %c0_11] : memref<8x14xf32, #tpu.memory_space<vmem>>, vector<8x14xf32>
      %c0_12 = arith.constant 0 : index
      %c0_13 = arith.constant 0 : index
      %13 = vector.load %arg4[%c0_12, %c0_13] : memref<1x14xf32, #tpu.memory_space<vmem>>, vector<1x14xf32>
      %14 = vector.broadcast %13 : vector<1x14xf32> to vector<8x14xf32>
      %15 = arith.addf %12, %14 : vector<8x14xf32>
      %c0_14 = arith.constant 0 : index
      %c0_15 = arith.constant 0 : index
      %16 = vector.load %arg5[%c0_14, %c0_15] : memref<8x14xf32, #tpu.memory_space<vmem>>, vector<8x14xf32>
      tpu.vector_store %arg5[%c0_14, %c0_15], %15 {strides = array<i32>} : memref<8x14xf32, #tpu.memory_space<vmem>>, vector<8x14xf32>,
    } else {
    }
    return
  }
  func.func @transform_0(%arg0: i32, %arg1: i32) -> (i32, i32) {
    %c0_i32 = arith.constant 0 : i32
    return %arg0, %arg1 : i32, i32
  }
  func.func @transform_1(%arg0: i32, %arg1: i32) -> (i32, i32) {
    %c0_i32 = arith.constant 0 : i32
    %c0_i32_0 = arith.constant 0 : i32
    return %arg1, %c0_i32 : i32, i32
  }
  func.func @transform_2(%arg0: i32, %arg1: i32) -> (i32, i32) {
    %c0_i32 = arith.constant 0 : i32
    %c0_i32_0 = arith.constant 0 : i32
    %c0_i32_1 = arith.constant 0 : i32
    return %c0_i32, %c0_i32_0 : i32, i32
  }
  func.func @transform_3(%arg0: i32, %arg1: i32) -> (i32, i32) {
    %c0_i32 = arith.constant 0 : i32
    %c0_i32_0 = arith.constant 0 : i32
    return %arg0, %c0_i32 : i32, i32
  }
}

</mosaic_0001>

<bundles_post_ra>
// kernel: tpu_custom_call.1
= control target key start
LH: loop header
LB: loop body
LE: loop exit
PB: predicated region body
PF: predicated region fallthrough
CT: control target
= control target key end

     0   :  { %v174_v1 = vmov 0.0   ;;  %vm175_vm0 = vmmov 0   ;;  %vm19_vm1 = vcmask 113664   ;;  %s221_s0 = inlined_call_operand.vmem [shape: f32[8,32], index: 0, kind: input, shape index: {}]   ;;  %s222_s1 = inlined_call_operand.vmem [shape: f32[32,14], index: 1, kind: input, shape index: {}]   ;;  %s223_s2 = inlined_call_operand.vmem [shape: f32[1,14], index: 2, kind: input, shape index: {}]   ;;  %s224_s3 = inlined_call_operand.hbm [shape: f32[8,14], index: 3, kind: output, shape index: {}]  }
   0x1   :  { %v26_v0 = vld [vmem:[%s222_s1 + $0x18] sm:$0xff]  ;;  %138 = vmatprep.subr.mxu0 %v174_v1  ;;  %v25_v2 = vld [vmem:[%s222_s1 + $0x10] sm:$0xff]  ;;  %146 = vmatprep.mubr.msk.f32.mxu0 %vm175_vm0, %v174_v1 }
   0x2   :  { %8 = vsyncpa [#allocation4], 0  ;;  %139 = vmatpush3.msra.mxu0 %v26_v0  ;;  %20 = vst.msk [vmem:[#allocation2] sm:$0xff] %vm19_vm1, %v174_v1  ;;  %v24_v3 = vld [vmem:[%s222_s1 + $0x8] sm:$0xff]  ;;  %v23_v4 = vld [vmem:[%s222_s1] sm:$0xff]  ;;  %vm27_vm2 = vcmask 261120  }
   0x3   :  { %140 = vmatprep.subr.mxu0 %v174_v1  ;;  %v22_v5 = vld [vmem:[%s221_s0] sm:$0xff]  ;;  %s176_s1 = smov [#allocation3]  }
   0x4   :  { %141 = vmatpush3.msra.mxu0 %v25_v2  ;;  %v132_v10 = vld [vmem:[%s223_s2] ss:$0 sm:$0xff]  ;;  %s123_s24 = sshll.u32 %s176_s1, 4  ;;  %s124_s24 = int_to_ptr.vmem [resolvable:$true] %s123_s24 }
   0x5   :  { %142 = vmatprep.subr.mxu0 %v174_v1  ;;  %s152_s0 = scalar_lea.vmem %s124_s24, 128  ;;  %p157_p1 = scmp.lt.s32.totalorder %s124_s24, %s124_s24 }
   0x6   :  { %143 = vmatpush3.msra.mxu0 %v24_v3  ;;  %p153_p0 = scmp.ne.s32.totalorder %s124_s24, %s152_s0  ;;  %p158_p2 = scmp.lt.s32.totalorder %s152_s0, %s152_s0 }
   0x7   :  { %144 = vmatprep.subr.mxu0 %v174_v1 }
   0x8   :  { %145 = vmatpush3.msra.mxu0 %v23_v4  ;;  %p159_p3 = por %p158_p2, %p157_p1 }
   0x9   :  { %147 = vmatmul.mubr.msk.f32.vlgmr.msra.gmra.mxu0 %vm27_vm2, %v22_v5  ;;  %v21_v6 = vld [vmem:[#allocation2] sm:$0xff] }
   0xa   :  { %p160_p4 = pnand %p159_p3, %p153_p0 }
  0xc9   :  { %v97_v7 = vpop.f32.mrf.mxu0 }
  0xca   :  { %v101_v8 = vadd.f32 %v97_v7, %v21_v6 }
  0xcb   :  { %v148_v9 = vpop.f32.mrf.mxu0 }
  0xcc   :  { %103 = vst.msk [vmem:[#allocation2] sm:$0xff] %vm19_vm1, %v101_v8 }
  0xd3   :  { %v107_v11 = vld [vmem:[#allocation2] sm:$0xff] }
  0xd4   :  { %v115_v12 = vadd.f32 %v132_v10, %v107_v11 }
  0xd6   :  { %116 = vst.msk [vmem:[#allocation3] sm:$0xff] %vm19_vm1, %v115_v12 }
  0xd7   :  { %163 = shalt.err (!%p160_p4)
}
  0xd8   :  { %126 = dma.vmem_to_hbm [thread:$0]  %s124_s24, 128, %s224_s3, [#allocation4]  }
  0xd9   :  { %172 = dma.done.wait [#allocation4], 128  }
  0xda   :  { %173 = vsyncadd [#allocation4], 4294967168 }
  0xdb   :  { %130 = vsyncpa [#allocation4], 1 }

</bundles_post_ra>
